<compile_context>
chip_gen: v7x
topology: tpu7x:2x2x1
jax: 0.10.0
libtpu: 0.0.40
codegen_flags: <defaults>
</compile_context>

<pallas_src>
import math

import jax
import jax.numpy as jnp
from jax.experimental import pallas as pl
from jax.experimental.pallas import tpu as pltpu

TAU = 0.8                 # self.tau
CONTRAST_LAMDA = 0.5      # self.contrast_lamda (unused in forward, kept for fidelity)


def _round_up(x, m):
    return (x + m - 1) // m * m


def _l2_normalize(x, eps=1e-12):
    # F.normalize(p=2, dim=-1): x / max(||x||_2, eps)
    return x / jnp.maximum(jnp.sqrt(jnp.sum(x * x, axis=-1, keepdims=True)), eps)


def _make_kernel(tm, tn, n_col_blocks, pad_cols):
    def kernel(z1_ref, z2_ref, nts_ref, gat_ref, loss_ref, fenzi_acc, fenmu_acc):
        j = pl.program_id(1)

        # Initialize both accumulators with now_to_skill (precomputed in the wrapper).
        @pl.when(j == 0)
        def _():
            nts = nts_ref[...]
            fenzi_acc[...] = nts
            fenmu_acc[...] = nts

        # z1n already normalized + bf16 from the wrapper; z2n normalized, pre-scaled by
        # 1/tau, bf16 and fully VMEM-resident (constant index_map) — slice per j.
        z1n = z1_ref[...]                                        # (tm, h) bf16
        col0 = pl.multiple_of(j * tn, tn)
        z2n = z2_ref[pl.ds(col0, tn), :]                         # (tn, h) bf16

        # (tm,h) x (tn,h) contracted on h (no RHS transpose); bf16 MXU, f32 accumulate.
        s = jax.lax.dot_general(
            z1n, z2n,
            dimension_numbers=(((1,), (1,)), ((), ())),
            preferred_element_type=jnp.float32)                  # (tm, tn)
        # 1/tau is already folded into z2n, so fx = exp(s) directly.
        # TODO(synk): on v7x consider bf16 exp (bf16 EUP) if tolerance allows; keep f32
        # for v5e (no bf16 EUP) and PyTorch-matching numerics.
        fx = jnp.exp(s)

        gat = gat_ref[...].astype(jnp.float32)                   # int8 0/1 mask tile
        # If a bundle dump ever shows these two XLU row-reductions saturating, offload
        # them to the (nearly idle, K=h) MXU as (fx*gat) @ ones((tn,1)) / fx @ ones.
        fenzi_acc[...] += jnp.sum(fx * gat, axis=-1, keepdims=True)
        fenmu_acc[...] += jnp.sum(fx, axis=-1, keepdims=True)

        @pl.when(j == n_col_blocks - 1)
        def _():
            fenmu = fenmu_acc[...]
            if pad_cols:
                # Padded z2 rows are exactly zero -> each padded column contributed
                # exp(0) = 1 to fenmu (and 0 to fenzi, since padded gat columns are 0).
                fenmu = fenmu - jnp.float32(pad_cols)
            # -log(fenzi / (fenmu + 1e-8)) == log(fenmu + 1e-8) - log(fenzi)
            loss_ref[...] = (jnp.log(fenmu + jnp.float32(1e-8))
                             - jnp.log(fenzi_acc[...]))

    return kernel


def contrast_loss(x1, x2, pro_skill_embed, gat_matrix, *,
                  tau=TAU, tm=512, tn=2048,
                  vmem_limit_bytes=40 * 1024 * 1024):
    """ContrastLoss.forward — returns a scalar float32 loss.

    gat_matrix must be a 0/1 mask, ideally already int8/bool (a float mask forces an
    N^2 cast here, which can cost more HBM traffic than the kernel itself).
    """
    n, h = x1.shape
    assert x2.shape == (n, h) and pro_skill_embed.shape == (n, h)
    assert gat_matrix.shape == (n, n)

    # Lane-aligned tiles (multiples of 128), clamped for tiny problems. Defaults give a
    # ~1 MB int8 gat tile per grid step and ~12-16 MB total VMEM (gat double-buffer +
    # (tm,tn) f32 temporaries + resident z2n), fitting the 40 MiB cap on every
    # generation (v7x: 64 MiB physical per TC, so do not request more than ~40-48 MiB).
    tm = min(tm, _round_up(n, 128))
    tn = min(tn, _round_up(n, 128))
    n_rows = _round_up(n, tm)
    n_cols = _round_up(n, tn)
    n_row_blocks = n_rows // tm      # at production N keep >= 2 (ideally even) so both
    n_col_blocks = n_cols // tn      # v7x TensorCores get row blocks.
    pad_rows = n_rows - n
    pad_cols = n_cols - n

    f32 = jnp.float32
    inv_tau = jnp.float32(1.0 / tau)

    # O(N*H) preprocessing hoisted out of the O(N^2) kernel (it would otherwise be
    # recomputed for every row/column block): normalization, bf16 cast, 1/tau fold and
    # now_to_skill. Padded rows are zeros (z1n/z2n) / ones (nts) so no edge masking is
    # needed in-kernel and all padded-row losses stay finite (they are dropped anyway).
    z1n = _l2_normalize(x1.astype(f32)).astype(jnp.bfloat16)
    z2n = (_l2_normalize(x2.astype(f32)) * inv_tau).astype(jnp.bfloat16)
    nts = jnp.exp(jnp.sum(pro_skill_embed.astype(f32) * x1.astype(f32),
                          axis=-1, keepdims=True) * inv_tau)
    z1n = jnp.pad(z1n, ((0, pad_rows), (0, 0)))
    z2n = jnp.pad(z2n, ((0, pad_cols), (0, 0)))
    nts = jnp.pad(nts, ((0, pad_rows), (0, 0)), constant_values=1.0)

    # gat: int8 0/1 mask. Zero-copy when already int8 and tile-aligned; otherwise an
    # int8-only zero-pad (4x cheaper than the old f32 materialize + cast).
    gat = gat_matrix
    if gat.dtype != jnp.int8:
        # TODO(synk): callers should pass int8/bool (or bit-packed) gat; a float mask
        # forces this N^2 cast and non-0/1 values would be silently truncated.
        gat = gat.astype(jnp.int8)
    if gat.shape != (n_rows, n_cols):
        gat = jnp.pad(gat, ((0, pad_rows), (0, pad_cols)))

    kernel = _make_kernel(tm, tn, n_col_blocks, pad_cols)

    per_row = pl.pallas_call(
        kernel,
        out_shape=jax.ShapeDtypeStruct((n_rows, 1), jnp.float32),
        grid_spec=pltpu.PrefetchScalarGridSpec(
            num_scalar_prefetch=0,
            grid=(n_row_blocks, n_col_blocks),
            in_specs=[
                pl.BlockSpec((tm, h), lambda i, j: (i, 0)),        # z1n rows (bf16)
                pl.BlockSpec((n_cols, h), lambda i, j: (0, 0)),    # z2n resident (bf16)
                pl.BlockSpec((tm, 1), lambda i, j: (i, 0)),        # now_to_skill (f32)
                pl.BlockSpec((tm, tn), lambda i, j: (i, j)),       # gat mask tile (int8)
            ],
            out_specs=pl.BlockSpec((tm, 1), lambda i, j: (i, 0)),
            scratch_shapes=[
                pltpu.VMEM((tm, 1), jnp.float32),   # fenzi accumulator
                pltpu.VMEM((tm, 1), jnp.float32),   # fenmu accumulator
            ],
        ),
        compiler_params=pltpu.CompilerParams(
            dimension_semantics=("parallel", "arbitrary"),
            vmem_limit_bytes=vmem_limit_bytes,
        ),
    )(z1n, z2n, nts, gat)

    # Drop padded rows; final mean in the wrapper (output is one f32 per row — tiny).
    return jnp.mean(per_row[:n, 0])


def _reference(x1, x2, ps, gat, *, tau=TAU, match_kernel_bf16=False):
    """Pure-JAX reference of the PyTorch forward (for correctness checks)."""
    f32 = jnp.float32
    x1 = x1.astype(f32)
    x2 = x2.astype(f32)
    ps = ps.astype(f32)
    z1n = _l2_normalize(x1)
    z2n = _l2_normalize(x2)
    if match_kernel_bf16:
        s = jax.lax.dot_general(
            z1n.astype(jnp.bfloat16),
            (z2n * jnp.float32(1.0 / tau)).astype(jnp.bfloat16),
            dimension_numbers=(((1,), (1,)), ((), ())),
            preferred_element_type=jnp.float32)
        fx = jnp.exp(s)
    else:
        fx = jnp.exp((z1n @ z2n.T) / tau)
    nts = jnp.exp(jnp.sum(ps * x1, axis=-1, keepdims=True) / tau)
    g = gat.astype(f32)
    fenzi = nts + jnp.sum(fx * g, axis=-1, keepdims=True)
    fenmu = nts + jnp.sum(fx, axis=-1, keepdims=True)
    return jnp.mean(-jnp.log(fenzi / (fenmu + 1e-8)))


if __name__ == "__main__":
    # Small shapes consistent with the module: num_nodes=16, hidden=32
    # (a single torch batch, since 16 <= batch_size=10000).
    N, H = 16, 32

    key = jax.random.PRNGKey(0)
    k1, k2, k3, k4, k5, k6, k7, k8, k9 = jax.random.split(key, 9)

    x1 = jax.random.normal(k1, (N, H), dtype=jnp.float32)
    x2 = jax.random.normal(k2, (N, H), dtype=jnp.float32)
    pro_skill_embed = jax.random.normal(k3, (N, H), dtype=jnp.float32)
    # Synthetic stand-in for glo.get_value('gat_matrix'): 0/1 adjacency, pre-quantized int8.
    gat_matrix = (jax.random.uniform(k4, (N, N)) > 0.5).astype(jnp.int8)

    # project_linear weights (xavier_uniform, gain=1.414) — created but unused in forward.
    bound = 1.414 * math.sqrt(6.0 / (H + H))
    _w1 = jax.random.uniform(k5, (H, H), jnp.float32, -bound, bound)
    _w2 = jax.random.uniform(k6, (H, H), jnp.float32, -bound, bound)
    # TODO(synk): project_linear / ELU path is dead code in forward(); not lowered to Pallas.

    loss = contrast_loss(x1, x2, pro_skill_embed, gat_matrix)
    jax.block_until_ready(loss)

    ref_bf16 = _reference(x1, x2, pro_skill_embed, gat_matrix, match_kernel_bf16=True)
    ref_f32 = _reference(x1, x2, pro_skill_embed, gat_matrix, match_kernel_bf16=False)
    assert abs(float(loss) - float(ref_bf16)) < 2e-3, (float(loss), float(ref_bf16))
    assert abs(float(loss) - float(ref_f32)) < 5e-2, (float(loss), float(ref_f32))

    # Second check: multiple row/column blocks with ragged N — exercises the resident-z2
    # per-block slicing and the exact fenmu padded-column correction.
    N2 = 200
    y1 = jax.random.normal(k7, (N2, H), dtype=jnp.float32)
    y2 = jax.random.normal(k8, (N2, H), dtype=jnp.float32)
    ps2 = jax.random.normal(k9, (N2, H), dtype=jnp.float32)
    gat2 = (jax.random.uniform(k4, (N2, N2)) > 0.5).astype(jnp.int8)

    loss2 = contrast_loss(y1, y2, ps2, gat2, tm=128, tn=128)
    jax.block_until_ready(loss2)
    ref2_bf16 = _reference(y1, y2, ps2, gat2, match_kernel_bf16=True)
    ref2_f32 = _reference(y1, y2, ps2, gat2, match_kernel_bf16=False)
    assert abs(float(loss2) - float(ref2_bf16)) < 2e-3, (float(loss2), float(ref2_bf16))
    assert abs(float(loss2) - float(ref2_f32)) < 5e-2, (float(loss2), float(ref2_f32))

    print("KERNEL_OK")
</pallas_src>

<mosaic_0001>
module attributes {stable_mosaic.version = 11 : i64} {
  func.func @kernel(%arg0: i32, %arg1: i32, %arg2: memref<128x32xbf16, #tpu.memory_space<vmem>>, %arg3: memref<128x32xbf16, #tpu.memory_space<vmem>>, %arg4: memref<128x1xf32, #tpu.memory_space<vmem>>, %arg5: memref<128x128xi8, #tpu.memory_space<vmem>>, %arg6: memref<128x1xf32, #tpu.memory_space<vmem>>, %arg7: memref<128x1xf32, #tpu.memory_space<vmem>>, %arg8: memref<128x1xf32, #tpu.memory_space<vmem>>) attributes {dimension_semantics = [#tpu.dimension_semantics<parallel>, #tpu.dimension_semantics<arbitrary>], iteration_bounds = array<i64: 1, 1>, scalar_prefetch = 0 : i64, scratch_operands = 2 : i64, tpu.core_type = #tpu.core_type<tc>, window_params = [{transform_indices = @transform_0, window_bounds = array<i64: 128, 32>}, {pipeline_mode = #tpu.pipeline_mode<synchronous>, transform_indices = @transform_1, window_bounds = array<i64: 128, 32>}, {transform_indices = @transform_2, window_bounds = array<i64: 128, 1>}, {transform_indices = @transform_3, window_bounds = array<i64: 128, 128>}, {transform_indices = @transform_4, window_bounds = array<i64: 128, 1>}]} {
    %c0_i32 = arith.constant 0 : i32
    %0 = arith.cmpi eq, %arg1, %c0_i32 : i32
    %1 = arith.extui %0 : i1 to i32
    %c0_i32_0 = arith.constant 0 : i32
    %2 = arith.cmpi ne, %1, %c0_i32_0 : i32
    scf.if %2 {
      %c0_17 = arith.constant 0 : index
      %c0_18 = arith.constant 0 : index
      %26 = vector.load %arg4[%c0_17, %c0_18] : memref<128x1xf32, #tpu.memory_space<vmem>>, vector<128x1xf32>
      %c0_19 = arith.constant 0 : index
      %c0_20 = arith.constant 0 : index
      %27 = vector.load %arg7[%c0_19, %c0_20] : memref<128x1xf32, #tpu.memory_space<vmem>>, vector<128x1xf32>
      tpu.vector_store %arg7[%c0_19, %c0_20], %26 {strides = array<i32>} : memref<128x1xf32, #tpu.memory_space<vmem>>, vector<128x1xf32>,
      %c0_21 = arith.constant 0 : index
      %c0_22 = arith.constant 0 : index
      %28 = vector.load %arg8[%c0_21, %c0_22] : memref<128x1xf32, #tpu.memory_space<vmem>>, vector<128x1xf32>
      tpu.vector_store %arg8[%c0_21, %c0_22], %26 {strides = array<i32>} : memref<128x1xf32, #tpu.memory_space<vmem>>, vector<128x1xf32>,
    } else {
    }
    %c0 = arith.constant 0 : index
    %c0_1 = arith.constant 0 : index
    %3 = vector.load %arg2[%c0, %c0_1] : memref<128x32xbf16, #tpu.memory_space<vmem>>, vector<128x32xbf16>
    %c128_i32 = arith.constant 128 : i32
    %4 = arith.muli %arg1, %c128_i32 : i32
    %5 = tpu.assume_multiple %4, 128 : i32
    %6 = arith.index_cast %5 : i32 to index
    %c0_2 = arith.constant 0 : index
    %7 = vector.load %arg3[%6, %c0_2] : memref<128x32xbf16, #tpu.memory_space<vmem>>, vector<128x32xbf16>
    %cst = arith.constant dense<0.000000e+00> : vector<128x128xf32>
    %8 = tpu.matmul %3, %7, %cst {dimension_numbers = #tpu.dot_dimension_numbers<[1], [1], [0], [0], [0, 0, 1, 0], [], []>} : vector<128x32xbf16>, vector<128x32xbf16>, vector<128x128xf32> -> vector<128x128xf32>
    %9 = math.exp %8 : vector<128x128xf32>
    %c0_3 = arith.constant 0 : index
    %c0_4 = arith.constant 0 : index
    %10 = vector.load %arg5[%c0_3, %c0_4] : memref<128x128xi8, #tpu.memory_space<vmem>>, vector<128x128xi8>
    %11 = arith.sitofp %10 : vector<128x128xi8> to vector<128x128xf32>
    %c0_5 = arith.constant 0 : index
    %c0_6 = arith.constant 0 : index
    %12 = vector.load %arg7[%c0_5, %c0_6] : memref<128x1xf32, #tpu.memory_space<vmem>>, vector<128x1xf32>
    %13 = arith.mulf %9, %11 : vector<128x128xf32>
    %cst_7 = arith.constant dense<0.000000e+00> : vector<128xf32>
    %14 = vector.multi_reduction <add>, %13, %cst_7 [1] : vector<128x128xf32> to vector<128xf32>
    %15 = vector.shape_cast %14 : vector<128xf32> to vector<128x1xf32>
    %16 = arith.addf %12, %15 : vector<128x1xf32>
    %c0_8 = arith.constant 0 : index
    %c0_9 = arith.constant 0 : index
    %17 = vector.load %arg7[%c0_8, %c0_9] : memref<128x1xf32, #tpu.memory_space<vmem>>, vector<128x1xf32>
    tpu.vector_store %arg7[%c0_8, %c0_9], %16 {strides = array<i32>} : memref<128x1xf32, #tpu.memory_space<vmem>>, vector<128x1xf32>,
    %c0_10 = arith.constant 0 : index
    %c0_11 = arith.constant 0 : index
    %18 = vector.load %arg8[%c0_10, %c0_11] : memref<128x1xf32, #tpu.memory_space<vmem>>, vector<128x1xf32>
    %cst_12 = arith.constant dense<0.000000e+00> : vector<128xf32>
    %19 = vector.multi_reduction <add>, %9, %cst_12 [1] : vector<128x128xf32> to vector<128xf32>
    %20 = vector.shape_cast %19 : vector<128xf32> to vector<128x1xf32>
    %21 = arith.addf %18, %20 : vector<128x1xf32>
    %c0_13 = arith.constant 0 : index
    %c0_14 = arith.constant 0 : index
    %22 = vector.load %arg8[%c0_13, %c0_14] : memref<128x1xf32, #tpu.memory_space<vmem>>, vector<128x1xf32>
    tpu.vector_store %arg8[%c0_13, %c0_14], %21 {strides = array<i32>} : memref<128x1xf32, #tpu.memory_space<vmem>>, vector<128x1xf32>,
    %c0_i32_15 = arith.constant 0 : i32
    %23 = arith.cmpi eq, %arg1, %c0_i32_15 : i32
    %24 = arith.extui %23 : i1 to i32
    %c0_i32_16 = arith.constant 0 : i32
    %25 = arith.cmpi ne, %24, %c0_i32_16 : i32
    scf.if %25 {
      %c0_17 = arith.constant 0 : index
      %c0_18 = arith.constant 0 : index
      %26 = vector.load %arg8[%c0_17, %c0_18] : memref<128x1xf32, #tpu.memory_space<vmem>>, vector<128x1xf32>
      %cst_19 = arith.constant 1.120000e+02 : f32
      %27 = vector.broadcast %cst_19 : f32 to vector<128x1xf32>
      %28 = arith.subf %26, %27 : vector<128x1xf32>
      %cst_20 = arith.constant 9.99999993E-9 : f32
      %29 = vector.broadcast %cst_20 : f32 to vector<128x1xf32>
      %30 = arith.addf %28, %29 : vector<128x1xf32>
      %31 = math.log %30 : vector<128x1xf32>
      %c0_21 = arith.constant 0 : index
      %c0_22 = arith.constant 0 : index
      %32 = vector.load %arg7[%c0_21, %c0_22] : memref<128x1xf32, #tpu.memory_space<vmem>>, vector<128x1xf32>
      %33 = math.log %32 : vector<128x1xf32>
      %34 = arith.subf %31, %33 : vector<128x1xf32>
      %c0_23 = arith.constant 0 : index
      %c0_24 = arith.constant 0 : index
      %35 = vector.load %arg6[%c0_23, %c0_24] : memref<128x1xf32, #tpu.memory_space<vmem>>, vector<128x1xf32>
      tpu.vector_store %arg6[%c0_23, %c0_24], %34 {strides = array<i32>} : memref<128x1xf32, #tpu.memory_space<vmem>>, vector<128x1xf32>,
    } else {
    }
    return
  }
  func.func @transform_0(%arg0: i32, %arg1: i32) -> (i32, i32) {
    %c0_i32 = arith.constant 0 : i32
    %c0_i32_0 = arith.constant 0 : i32
    return %arg0, %c0_i32 : i32, i32
  }
  func.func @transform_1(%arg0: i32, %arg1: i32) -> (i32, i32) {
    %c0_i32 = arith.constant 0 : i32
    %c0_i32_0 = arith.constant 0 : i32
    %c0_i32_1 = arith.constant 0 : i32
    return %c0_i32, %c0_i32_0 : i32, i32
  }
  func.func @transform_2(%arg0: i32, %arg1: i32) -> (i32, i32) {
    %c0_i32 = arith.constant 0 : i32
    %c0_i32_0 = arith.constant 0 : i32
    return %arg0, %c0_i32 : i32, i32
  }
  func.func @transform_3(%arg0: i32, %arg1: i32) -> (i32, i32) {
    %c0_i32 = arith.constant 0 : i32
    return %arg0, %arg1 : i32, i32
  }
  func.func @transform_4(%arg0: i32, %arg1: i32) -> (i32, i32) {
    %c0_i32 = arith.constant 0 : i32
    %c0_i32_0 = arith.constant 0 : i32
    return %arg0, %c0_i32 : i32, i32
  }
}

</mosaic_0001>

<bundles_post_ra>
// kernel: tpu_custom_call.1
= control target key start
LH: loop header
LB: loop body
LE: loop exit
PB: predicated region body
PF: predicated region fallthrough
CT: control target
= control target key end

     0   :  { %vm188_vm0 = vcmask 261120   ;;  %vm38_vm1 = vcmask 7168   ;;  %s1299_s1 = inlined_call_operand.vmem [shape: bf16[128,32], index: 1, kind: input, shape index: {}]   ;;  %s1300_s0 = inlined_call_operand.vmem [shape: bf16[128,32], index: 0, kind: input, shape index: {}]   ;;  %s1301_s2 = inlined_call_operand.vmem [shape: f32[128,1], index: 2, kind: input, shape index: {}]   ;;  %s1302_s3 = inlined_call_operand.vmem [shape: s8[128,128], index: 3, kind: input, shape index: {}]   ;;  %s1303_s4 = inlined_call_operand.vmem [shape: f32[128,1], index: 4, kind: output, shape index: {}]  }
   0x1   :  { %v868_v0 = vld [vmem:[%s1299_s1] sm:$0xff]   ;;  %v869_v1 = vld [vmem:[%s1299_s1 + $0x8] sm:$0xff]   ;;  %v870_v3 = vld [vmem:[%s1299_s1 + $0x10] sm:$0xff]  }
   0x2   :  { %852 = vmatprep.subr.msk.bf16.mxu0 %vm188_vm0, %v868_v0  ;;  %853 = vmatprep.subr.msk.bf16.mxu1 %vm188_vm0, %v868_v0  ;;  %v214_v2 = vsel %vm188_vm0, %v868_v0, 0  ;;  %v217_v4 = vsel %vm188_vm0, %v869_v1, 0  ;;  %v876_v5 = vld [vmem:[%s1300_s0] sm:$0xff]   ;;  %v220_v7 = vsel %vm188_vm0, %v870_v3, 0  ;;  %v871_v8 = vld [vmem:[%s1299_s1 + $0x18] sm:$0xff]   ;;  %v873_v12 = vld [vmem:[%s1299_s1 + $0x28] sm:$0xff]  }
   0x3   :  { %805 = vmatpush3.bf16.xpose.msra.mxu0 %v214_v2  ;;  %844 = vmatpush3.bf16.xpose.msra.mxu1 %v214_v2  ;;  %v877_v6 = vld [vmem:[%s1300_s0 + $0x20] sm:$0xff]   ;;  %v223_v9 = vsel %vm188_vm0, %v871_v8, 0  ;;  %v229_v13 = vsel %vm188_vm0, %v873_v12, 0  ;;  %v874_v14 = vld [vmem:[%s1299_s1 + $0x30] sm:$0xff]   ;;  %v875_v16 = vld [vmem:[%s1299_s1 + $0x38] sm:$0xff]  }
   0x4   :  { %854 = vmatprep.subr.msk.bf16.mxu0 %vm188_vm0, %v869_v1  ;;  %855 = vmatprep.subr.msk.bf16.mxu1 %vm188_vm0, %v869_v1  ;;  %v872_v10 = vld [vmem:[%s1299_s1 + $0x20] sm:$0xff]   ;;  %v232_v15 = vsel %vm188_vm0, %v874_v14, 0  ;;  %v235_v17 = vsel %vm188_vm0, %v875_v16, 0  ;;  %v878_v18 = vld [vmem:[%s1300_s0 + $0x8] sm:$0xff]   ;;  %v880_v20 = vld [vmem:[%s1300_s0 + $0x10] sm:$0xff]  }
   0x5   :  { %820 = vmatprep.mubr.msk.bf16.mxu0 %vm188_vm0, %v876_v5  ;;  %828 = vmatprep.mubr.msk.bf16.mxu1 %vm188_vm0, %v877_v6  ;;  %v226_v11 = vsel %vm188_vm0, %v872_v10, 0  ;;  %v879_v19 = vld [vmem:[%s1300_s0 + $0x28] sm:$0xff]   ;;  %v882_v21 = vld [vmem:[%s1300_s0 + $0x30] sm:$0xff]   ;;  %v881_v22 = vld [vmem:[%s1300_s0 + $0x18] sm:$0xff]  }
   0x6   :  { %v883_v23 = vld [vmem:[%s1300_s0 + $0x38] sm:$0xff]   ;;  %v32_v24 = vld [vmem:[%s1301_s2 + $0x50] sm:$0xff]  ;;  %v366_v50 = vld [vmem:[%s1302_s3] sm:$0xff] }
   0x7   :  { %65 = vst.msk [vmem:[#allocation3 + $0x50] sm:$0xff] %vm38_vm1, %v32_v24  ;;  %49 = vst.msk [vmem:[#allocation2 + $0x50] sm:$0xff] %vm38_vm1, %v32_v24  ;;  %v372_v52 = vunpack.c.2.s8 %v366_v50  ;;  %v368_v54 = vld [vmem:[%s1302_s3 + $0x10] sm:$0xff]  ;;  %v373_v56 = vunpack.c.3.s8 %v366_v50 }
   0x8   :  { %v380_v59 = vunpack.c.2.s8 %v368_v54  ;;  %v24_v61 = vld [vmem:[%s1301_s2 + $0x10] sm:$0xff]  ;;  %v381_v63 = vunpack.c.3.s8 %v368_v54 }
   0x9   :  { %v388_v58 = vcvt.s32.f32 %v372_v52  ;;  %v389_v62 = vcvt.s32.f32 %v373_v56  ;;  %57 = vst.msk [vmem:[#allocation3 + $0x10] sm:$0xff] %vm38_vm1, %v24_v61  ;;  %41 = vst.msk [vmem:[#allocation2 + $0x10] sm:$0xff] %vm38_vm1, %v24_v61  ;;  %v36_v52 = vld [vmem:[%s1301_s2 + $0x70] sm:$0xff]  ;;  %v37_v56 = vld [vmem:[%s1301_s2 + $0x78] sm:$0xff] }
   0xa   :  { %v396_v2 = vcvt.s32.f32 %v380_v59  ;;  %v397_v6 = vcvt.s32.f32 %v381_v63  ;;  %69 = vst.msk [vmem:[#allocation3 + $0x70] sm:$0xff] %vm38_vm1, %v36_v52  ;;  %53 = vst.msk [vmem:[#allocation2 + $0x70] sm:$0xff] %vm38_vm1, %v36_v52  ;;  %v27_v61 = vld [vmem:[%s1301_s2 + $0x28] sm:$0xff] }
   0xb   :  { %807 = vmatpush3.bf16.xpose.msra.mxu0 %v217_v4  ;;  %845 = vmatpush3.bf16.xpose.msra.mxu1 %v217_v4  ;;  %v25_v4 = vld [vmem:[%s1301_s2 + $0x18] sm:$0xff]  ;;  %70 = vst.msk [vmem:[#allocation3 + $0x78] sm:$0xff] %vm38_vm1, %v37_v56  ;;  %54 = vst.msk [vmem:[#allocation2 + $0x78] sm:$0xff] %vm38_vm1, %v37_v56 }
   0xc   :  { %856 = vmatprep.subr.msk.bf16.mxu0 %vm188_vm0, %v870_v3  ;;  %857 = vmatprep.subr.msk.bf16.mxu1 %vm188_vm0, %v870_v3  ;;  %v22_v3 = vld [vmem:[%s1301_s2] sm:$0xff]  ;;  %58 = vst.msk [vmem:[#allocation3 + $0x18] sm:$0xff] %vm38_vm1, %v25_v4  ;;  %42 = vst.msk [vmem:[#allocation2 + $0x18] sm:$0xff] %vm38_vm1, %v25_v4 }
   0xd   :  { %55 = vst.msk [vmem:[#allocation3] sm:$0xff] %vm38_vm1, %v22_v3  ;;  %39 = vst.msk [vmem:[#allocation2] sm:$0xff] %vm38_vm1, %v22_v3  ;;  %v34_v4 = vld [vmem:[%s1301_s2 + $0x60] sm:$0xff] }
   0xe   :  { %60 = vst.msk [vmem:[#allocation3 + $0x28] sm:$0xff] %vm38_vm1, %v27_v61  ;;  %44 = vst.msk [vmem:[#allocation2 + $0x28] sm:$0xff] %vm38_vm1, %v27_v61 }
   0xf   :  { %67 = vst.msk [vmem:[#allocation3 + $0x60] sm:$0xff] %vm38_vm1, %v34_v4  ;;  %51 = vst.msk [vmem:[#allocation2 + $0x60] sm:$0xff] %vm38_vm1, %v34_v4 }
  0x13   :  { %809 = vmatpush3.bf16.xpose.msra.mxu0 %v220_v7  ;;  %846 = vmatpush3.bf16.xpose.msra.mxu1 %v220_v7  ;;  %v371_v7 = vunpack.c.1.s8 %v366_v50 }
  0x14   :  { %858 = vmatprep.subr.msk.bf16.mxu0 %vm188_vm0, %v871_v8  ;;  %859 = vmatprep.subr.msk.bf16.mxu1 %vm188_vm0, %v871_v8 }
  0x1b   :  { %811 = vmatpush3.bf16.xpose.msra.mxu0 %v223_v9  ;;  %847 = vmatpush3.bf16.xpose.msra.mxu1 %v223_v9  ;;  %v370_v9 = vunpack.c.0.s8 %v366_v50  ;;  %v369_v50 = vld [vmem:[%s1302_s3 + $0x18] sm:$0xff] }
  0x1c   :  { %860 = vmatprep.subr.msk.bf16.mxu0 %vm188_vm0, %v872_v10  ;;  %861 = vmatprep.subr.msk.bf16.mxu1 %vm188_vm0, %v872_v10  ;;  %v382_v59 = vunpack.c.0.s8 %v369_v50  ;;  %v384_v3 = vunpack.c.2.s8 %v369_v50 }
  0x23   :  { %813 = vmatpush3.bf16.xpose.msra.mxu0 %v226_v11  ;;  %848 = vmatpush3.bf16.xpose.msra.mxu1 %v226_v11  ;;  %v30_v11 = vld [vmem:[%s1301_s2 + $0x40] sm:$0xff] }
  0x24   :  { %862 = vmatprep.subr.msk.bf16.mxu0 %vm188_vm0, %v873_v12  ;;  %863 = vmatprep.subr.msk.bf16.mxu1 %vm188_vm0, %v873_v12  ;;  %v33_v12 = vld [vmem:[%s1301_s2 + $0x58] sm:$0xff]  ;;  %63 = vst.msk [vmem:[#allocation3 + $0x40] sm:$0xff] %vm38_vm1, %v30_v11  ;;  %47 = vst.msk [vmem:[#allocation2 + $0x40] sm:$0xff] %vm38_vm1, %v30_v11 }
  0x25   :  { %66 = vst.msk [vmem:[#allocation3 + $0x58] sm:$0xff] %vm38_vm1, %v33_v12  ;;  %50 = vst.msk [vmem:[#allocation2 + $0x58] sm:$0xff] %vm38_vm1, %v33_v12  ;;  %v501_v12 = vld [vmem:[#allocation3 + $0x10] sm:$0xff] }
  0x2b   :  { %815 = vmatpush3.bf16.xpose.msra.mxu0 %v229_v13  ;;  %849 = vmatpush3.bf16.xpose.msra.mxu1 %v229_v13 }
  0x2c   :  { %864 = vmatprep.subr.msk.bf16.mxu0 %vm188_vm0, %v874_v14  ;;  %865 = vmatprep.subr.msk.bf16.mxu1 %vm188_vm0, %v874_v14 }
  0x33   :  { %817 = vmatpush3.bf16.xpose.msra.mxu0 %v232_v15  ;;  %850 = vmatpush3.bf16.xpose.msra.mxu1 %v232_v15  ;;  %v387_v15 = vcvt.s32.f32 %v371_v7 }
  0x34   :  { %866 = vmatprep.subr.msk.bf16.mxu0 %vm188_vm0, %v875_v16  ;;  %867 = vmatprep.subr.msk.bf16.mxu1 %vm188_vm0, %v875_v16  ;;  %v379_v16 = vunpack.c.1.s8 %v368_v54 }
  0x36   :  { %v395_v24 = vcvt.s32.f32 %v379_v16 }
  0x3b   :  { %819 = vmatpush3.bf16.xpose.msra.mxu0 %v235_v17  ;;  %851 = vmatpush3.bf16.xpose.msra.mxu1 %v235_v17 }
  0x42   :  { %821 = vmatmul.mubr.msk.bf16.vlgmr.msra.gmra.mrb[0].mxu0 %vm188_vm0, %v878_v18  ;;  %829 = vmatmul.mubr.msk.bf16.vlgmr.msra.gmra.mrb[0].mxu1 %vm188_vm0, %v879_v19  ;;  %v386_v18 = vcvt.s32.f32 %v370_v9  ;;  %v378_v19 = vunpack.c.0.s8 %v368_v54  ;;  %v400_v9 = vcvt.s32.f32 %v384_v3 }
  0x43   :  { %824 = vmatprep.mubr.msk.bf16.mxu0 %vm188_vm0, %v880_v20  ;;  %832 = vmatprep.mubr.msk.bf16.mxu1 %vm188_vm0, %v882_v21  ;;  %v31_v21 = vld [vmem:[%s1301_s2 + $0x48] sm:$0xff] }
  0x44   :  { %64 = vst.msk [vmem:[#allocation3 + $0x48] sm:$0xff] %vm38_vm1, %v31_v21  ;;  %48 = vst.msk [vmem:[#allocation2 + $0x48] sm:$0xff] %vm38_vm1, %v31_v21 }
  0x4a   :  { %825 = vmatmul.mubr.msk.bf16.gmra.mrb[4].mxu0 %vm188_vm0, %v881_v22  ;;  %833 = vmatmul.mubr.msk.bf16.gmra.mrb[4].mxu1 %vm188_vm0, %v883_v23 }
 0x115   :  { %v822_v25 = vpop.f32.mrb[0].mxu0  ;;  %v830_v26 = vpop.f32.mrb[0].mxu1 }
 0x116   :  { %v338_v27 = vmul.f32 1.442695, %v822_v25  ;;  %v354_v28 = vmul.f32 1.442695, %v830_v26  ;;  %v271_v29 = vpop.f32.mrb[1].mxu0  ;;  %v303_v30 = vpop.f32.mrb[1].mxu1  ;;  %v394_v26 = vcvt.s32.f32 %v378_v19 }
 0x117   :  { %v823_v31 = vpop.f32.mrb[2].mxu0  ;;  %v831_v32 = vpop.f32.mrb[2].mxu1  ;;  %v334_v36 = vmul.f32 1.442695, %v271_v29  ;;  %v350_v38 = vmul.f32 1.442695, %v303_v30 }
 0x118   :  { %884 = vpow2.f32 %v338_v27  ;;  %v340_v33 = vmul.f32 1.442695, %v823_v31  ;;  %v274_v34 = vpop.f32.mrb[3].mxu0  ;;  %v306_v35 = vpop.f32.mrb[3].mxu1  ;;  %v356_v37 = vmul.f32 1.442695, %v831_v32 }
 0x119   :  { %886 = vpow2.f32 %v354_v28  ;;  %v352_v45 = vmul.f32 1.442695, %v306_v35  ;;  %v336_v55 = vmul.f32 1.442695, %v274_v34  ;;  %v23_v32 = vld [vmem:[%s1301_s2 + $0x8] sm:$0xff]  ;;  %v499_v19 = vld [vmem:[#allocation3] sm:$0xff] }
 0x11a   :  { %888 = vpow2.f32 %v340_v33  ;;  %56 = vst.msk [vmem:[#allocation3 + $0x8] sm:$0xff] %vm38_vm1, %v23_v32  ;;  %40 = vst.msk [vmem:[#allocation2 + $0x8] sm:$0xff] %vm38_vm1, %v23_v32 }
 0x11b   :  { %890 = vpow2.f32 %v334_v36 }
 0x11c   :  { %892 = vpow2.f32 %v356_v37  ;;  %v367_v37 = vld [vmem:[%s1302_s3 + $0x8] sm:$0xff] }
 0x11d   :  { %v826_v39 = vpop.f32.mrb[4].mxu0  ;;  %v1090_v40 = vpop.f32.mrb[4].mxu1  ;;  %894 = vpow2.f32 %v350_v38 }
 0x11e   :  { %v1092_v41 = vpop.f32.mrb[5].mxu0  ;;  %v1094_v42 = vpop.f32.mrb[5].mxu1  ;;  %896 = vpow2.f32 %v352_v45  ;;  %v346_v13 = vmul.f32 1.442695, %v826_v39  ;;  %v362_v22 = vmul.f32 1.442695, %v1090_v40  ;;  %v377_v39 = vunpack.c.3.s8 %v367_v37 }
 0x11f   :  { %v827_v43 = vpop.f32.mrb[6].mxu0  ;;  %v1096_v44 = vpop.f32.mrb[6].mxu1  ;;  %898 = vpow2.f32 %v336_v55  ;;  %v342_v28 = vmul.f32 1.442695, %v1092_v41  ;;  %v358_v33 = vmul.f32 1.442695, %v1094_v42  ;;  %v376_v41 = vunpack.c.2.s8 %v367_v37 }
 0x120   :  { %v1098_v46 = vpop.f32.mrb[7].mxu0  ;;  %v1100_v47 = vpop.f32.mrb[7].mxu1  ;;  %v348_v10 = vmul.f32 1.442695, %v827_v43  ;;  %v364_v20 = vmul.f32 1.442695, %v1096_v44  ;;  %v393_v44 = vcvt.s32.f32 %v377_v39  ;;  %v375_v45 = vunpack.c.1.s8 %v367_v37 }
 0x121   :  { %v344_v27 = vmul.f32 1.442695, %v1098_v46  ;;  %v360_v31 = vmul.f32 1.442695, %v1100_v47  ;;  %v28_v43 = vld [vmem:[%s1301_s2 + $0x30] sm:$0xff]  ;;  %v29_v46 = vld [vmem:[%s1301_s2 + $0x38] sm:$0xff]  ;;  %v383_v55 = vunpack.c.1.s8 %v369_v50 }
 0x122   :  { %v885_v48 = vpop.eup %884  ;;  %900 = vpow2.f32 %v348_v10  ;;  %61 = vst.msk [vmem:[#allocation3 + $0x30] sm:$0xff] %vm38_vm1, %v28_v43  ;;  %45 = vst.msk [vmem:[#allocation2 + $0x30] sm:$0xff] %vm38_vm1, %v28_v43  ;;  %v391_v54 = vcvt.s32.f32 %v375_v45  ;;  %v500_v52 = vld [vmem:[#allocation3 + $0x8] sm:$0xff] }
 0x123   :  { %v887_v49 = vpop.eup %886  ;;  %519 = vadd.xlane.f32.xlu1 %v885_v48  ;;  %v420_v1 = vmul.f32 %v885_v48, %v388_v58  ;;  %902 = vpow2.f32 %v346_v13  ;;  %v392_v48 = vcvt.s32.f32 %v376_v41  ;;  %62 = vst.msk [vmem:[#allocation3 + $0x38] sm:$0xff] %vm38_vm1, %v29_v46  ;;  %46 = vst.msk [vmem:[#allocation2 + $0x38] sm:$0xff] %vm38_vm1, %v29_v46  ;;  %v399_v63 = vcvt.s32.f32 %v383_v55  ;;  %v509_v13 = vld [vmem:[#allocation3 + $0x50] sm:$0xff] }
 0x124   :  { %535 = vadd.xlane.f32.xlu0 %v887_v49  ;;  %v889_v51 = vpop.eup %888  ;;  %v428_v8 = vmul.f32 %v887_v49, %v396_v2  ;;  %904 = vpow2.f32 %v364_v20  ;;  %v374_v49 = vunpack.c.0.s8 %v367_v37  ;;  %v398_v2 = vcvt.s32.f32 %v382_v59  ;;  %v412_v41 = vld [vmem:[#allocation2 + $0x50] sm:$0xff] }
 0x125   :  { %v891_v53 = vpop.eup %890  ;;  %v421_v5 = vmul.f32 %v889_v51, %v389_v62  ;;  %906 = vpow2.f32 %v362_v22 }
 0x126   :  { %v893_v57 = vpop.eup %892  ;;  %v418_v25 = vmul.f32 %v891_v53, %v386_v18  ;;  %908 = vpow2.f32 %v344_v27  ;;  %v390_v58 = vcvt.s32.f32 %v374_v49  ;;  %v502_v18 = vld [vmem:[#allocation3 + $0x18] sm:$0xff] }
 0x127   :  { %521 = vadd.xlane.f32.xlu1 %v889_v51  ;;  %v895_v60 = vpop.eup %894  ;;  %v429_v14 = vmul.f32 %v893_v57, %v397_v6  ;;  %910 = vpow2.f32 %v342_v28  ;;  %v413_v49 = vld [vmem:[#allocation2 + $0x58] sm:$0xff] }
 0x128   :  { %515 = vadd.xlane.f32.xlu0 %v891_v53  ;;  %v897_v0 = vpop.eup %896  ;;  %v426_v30 = vmul.f32 %v895_v60, %v394_v26  ;;  %912 = vpow2.f32 %v360_v31  ;;  %v404_v31 = vld [vmem:[#allocation2 + $0x10] sm:$0xff] }
 0x129   :  { %v899_v17 = vpop.eup %898  ;;  %v427_v29 = vmul.f32 %v897_v0, %v395_v24  ;;  %914 = vpow2.f32 %v358_v33  ;;  %v510_v24 = vld [vmem:[#allocation3 + $0x58] sm:$0xff] }
 0x12a   :  { %v419_v23 = vmul.f32 %v899_v17, %v387_v15 }
 0x12b   :  { %537 = vadd.xlane.f32.xlu1 %v893_v57 }
 0x12c   :  { %531 = vadd.xlane.f32.xlu0 %v895_v60  ;;  %v901_v34 = vpop.eup %900  ;;  %v26_v60 = vld [vmem:[%s1301_s2 + $0x20] sm:$0xff] }
 0x12d   :  { %v903_v35 = vpop.eup %902  ;;  %v425_v53 = vmul.f32 %v901_v34, %v393_v44  ;;  %59 = vst.msk [vmem:[#allocation3 + $0x20] sm:$0xff] %vm38_vm1, %v26_v60  ;;  %43 = vst.msk [vmem:[#allocation2 + $0x20] sm:$0xff] %vm38_vm1, %v26_v60  ;;  %v403_v60 = vld [vmem:[#allocation2 + $0x8] sm:$0xff] }
 0x12e   :  { %v1149_v36 = vpop.eup %904  ;;  %v424_v57 = vmul.f32 %v903_v35, %v392_v48 }
 0x12f   :  { %533 = vadd.xlane.f32.xlu1 %v897_v0  ;;  %v1154_v38 = vpop.eup %906  ;;  %v385_v0 = vunpack.c.3.s8 %v369_v50 }
 0x130   :  { %438 = vadd.xlane.f32.xlu0 %v420_v1  ;;  %v909_v40 = vpop.eup %908  ;;  %v432_v11 = vmul.f32 %v1154_v38, %v400_v9 }
 0x131   :  { %v911_v42 = vpop.eup %910  ;;  %v423_v62 = vmul.f32 %v909_v40, %v391_v54  ;;  %v401_v7 = vcvt.s32.f32 %v385_v0  ;;  %v402_v0 = vld [vmem:[#allocation2] sm:$0xff] }
 0x132   :  { %v913_v47 = vpop.eup %912  ;;  %v422_v1 = vmul.f32 %v911_v42, %v390_v58 }
 0x133   :  { %440 = vadd.xlane.f32.xlu1 %v421_v5  ;;  %v915_v51 = vpop.eup %914  ;;  %v35_v5 = vld [vmem:[%s1301_s2 + $0x68] sm:$0xff]  ;;  %v431_v6 = vmul.f32 %v913_v47, %v399_v63  ;;  %v433_v10 = vmul.f32 %v1149_v36, %v401_v7 }
 0x134   :  { %454 = vadd.xlane.f32.xlu0 %v428_v8  ;;  %68 = vst.msk [vmem:[#allocation3 + $0x68] sm:$0xff] %vm38_vm1, %v35_v5  ;;  %52 = vst.msk [vmem:[#allocation2 + $0x68] sm:$0xff] %vm38_vm1, %v35_v5  ;;  %v430_v8 = vmul.f32 %v915_v51, %v398_v2 }
 0x137   :  { %456 = vadd.xlane.f32.xlu1 %v429_v14 }
 0x138   :  { %517 = vadd.xlane.f32.xlu0 %v899_v17 }
 0x13b   :  { %436 = vadd.xlane.f32.xlu1 %v419_v23 }
 0x13c   :  { %434 = vadd.xlane.f32.xlu0 %v418_v25  ;;  %v507_v25 = vld [vmem:[#allocation3 + $0x40] sm:$0xff] }
 0x13f   :  { %452 = vadd.xlane.f32.xlu1 %v427_v29 }
 0x140   :  { %450 = vadd.xlane.f32.xlu0 %v426_v30  ;;  %v508_v30 = vld [vmem:[#allocation3 + $0x48] sm:$0xff] }
 0x143   :  { %529 = vadd.xlane.f32.xlu1 %v901_v34 }
 0x144   :  { %527 = vadd.xlane.f32.xlu0 %v903_v35 }
 0x147   :  { %545 = vadd.xlane.f32.xlu1 %v1149_v36 }
 0x148   :  { %543 = vadd.xlane.f32.xlu0 %v1154_v38  ;;  %v405_v38 = vld [vmem:[#allocation2 + $0x18] sm:$0xff] }
 0x14b   :  { %525 = vadd.xlane.f32.xlu1 %v909_v40 }
 0x14c   :  { %523 = vadd.xlane.f32.xlu0 %v911_v42 }
 0x14f   :  { %541 = vadd.xlane.f32.xlu1 %v913_v47 }
 0x150   :  { %539 = vadd.xlane.f32.xlu0 %v915_v51 }
 0x153   :  { %448 = vadd.xlane.f32.xlu1 %v425_v53 }
 0x154   :  { %446 = vadd.xlane.f32.xlu0 %v424_v57 }
 0x157   :  { %444 = vadd.xlane.f32.xlu1 %v423_v62 }
 0x158   :  { %442 = vadd.xlane.f32.xlu0 %v422_v1 }
 0x15b   :  { %460 = vadd.xlane.f32.xlu1 %v431_v6 }
 0x15c   :  { %458 = vadd.xlane.f32.xlu0 %v430_v8  ;;  %v411_v8 = vld [vmem:[#allocation2 + $0x48] sm:$0xff] }
 0x15f   :  { %464 = vadd.xlane.f32.xlu1 %v433_v10 }
 0x160   :  { %462 = vadd.xlane.f32.xlu0 %v432_v11  ;;  %v410_v11 = vld [vmem:[#allocation2 + $0x40] sm:$0xff] }
 0x1b0   :  { %v520_v14 = vpop.xlane.xlu1 %519 }
 0x1b1   :  { %v536_v15 = vpop.xlane.xlu0 %535  ;;  %v549_v16 = vadd.f32 %v520_v14, %v501_v12 }
 0x1b2   :  { %v557_v17 = vadd.f32 %v536_v15, %v509_v13 }
 0x1b3   :  { %565 = vst.msk [vmem:[#allocation3 + $0x10] sm:$0xff] %vm38_vm1, %v549_v16 }
 0x1b4   :  { %573 = vst.msk [vmem:[#allocation3 + $0x50] sm:$0xff] %vm38_vm1, %v557_v17  ;;  %v522_v20 = vpop.xlane.xlu1 %521 }
 0x1b5   :  { %v516_v21 = vpop.xlane.xlu0 %515  ;;  %v550_v22 = vadd.f32 %v522_v20, %v502_v18  ;;  %v506_v20 = vld [vmem:[#allocation3 + $0x38] sm:$0xff] }
 0x1b6   :  { %v547_v23 = vadd.f32 %v516_v21, %v499_v19 }
 0x1b7   :  { %566 = vst.msk [vmem:[#allocation3 + $0x18] sm:$0xff] %vm38_vm1, %v550_v22  ;;  %v505_v22 = vld [vmem:[#allocation3 + $0x30] sm:$0xff] }
 0x1b8   :  { %563 = vst.msk [vmem:[#allocation3] sm:$0xff] %vm38_vm1, %v547_v23  ;;  %v538_v26 = vpop.xlane.xlu1 %537 }
 0x1b9   :  { %v532_v27 = vpop.xlane.xlu0 %531  ;;  %v558_v28 = vadd.f32 %v538_v26, %v510_v24 }
 0x1ba   :  { %v555_v29 = vadd.f32 %v532_v27, %v507_v25  ;;  %v584_v32 = vld [vmem:[#allocation3 + $0x10] sm:$0xff] }
 0x1bb   :  { %574 = vst.msk [vmem:[#allocation3 + $0x58] sm:$0xff] %vm38_vm1, %v558_v28  ;;  %v592_v34 = vld [vmem:[#allocation3 + $0x50] sm:$0xff]  ;;  %v774_v39 = vadd.f32 -112.0, %v584_v32 }
 0x1bc   :  { %571 = vst.msk [vmem:[#allocation3 + $0x40] sm:$0xff] %vm38_vm1, %v555_v29  ;;  %v534_v33 = vpop.xlane.xlu1 %533  ;;  %v782_v42 = vadd.f32 -112.0, %v592_v34 }
 0x1bd   :  { %v439_v35 = vpop.xlane.xlu0 %438  ;;  %v556_v36 = vadd.f32 %v534_v33, %v508_v30  ;;  %v616_v50 = vadd.f32 1e-08, %v774_v39  ;;  %v514_v33 = vld [vmem:[#allocation3 + $0x78] sm:$0xff] }
 0x1be   :  { %v468_v37 = vadd.f32 %v439_v35, %v404_v31  ;;  %v585_v40 = vld [vmem:[#allocation3 + $0x18] sm:$0xff]  ;;  %v624_v53 = vadd.f32 1e-08, %v782_v42 }
 0x1bf   :  { %572 = vst.msk [vmem:[#allocation3 + $0x48] sm:$0xff] %vm38_vm1, %v556_v36  ;;  %v775_v46 = vadd.f32 -112.0, %v585_v40  ;;  %v582_v57 = vld [vmem:[#allocation3] sm:$0xff]  ;;  %916 = vlog2.f32 %v616_v50  ;;  %v513_v36 = vld [vmem:[#allocation3 + $0x70] sm:$0xff] }
 0x1c0   :  { %485 = vst.msk [vmem:[#allocation2 + $0x10] sm:$0xff] %vm38_vm1, %v468_v37  ;;  %v441_v43 = vpop.xlane.xlu1 %440  ;;  %918 = vlog2.f32 %v624_v53  ;;  %v772_v2 = vadd.f32 -112.0, %v582_v57  ;;  %v503_v53 = vld [vmem:[#allocation3 + $0x20] sm:$0xff] }
 0x1c1   :  { %v455_v44 = vpop.xlane.xlu0 %454  ;;  %v469_v45 = vadd.f32 %v441_v43, %v405_v38  ;;  %v617_v58 = vadd.f32 1e-08, %v775_v46 }
 0x1c2   :  { %v593_v47 = vld [vmem:[#allocation3 + $0x58] sm:$0xff]  ;;  %v476_v48 = vadd.f32 %v455_v44, %v412_v41  ;;  %v614_v13 = vadd.f32 1e-08, %v772_v2 }
 0x1c3   :  { %v783_v51 = vadd.f32 -112.0, %v593_v47  ;;  %486 = vst.msk [vmem:[#allocation2 + $0x18] sm:$0xff] %vm38_vm1, %v469_v45  ;;  %v590_v9 = vld [vmem:[#allocation3 + $0x40] sm:$0xff] }
 0x1c4   :  { %493 = vst.msk [vmem:[#allocation2 + $0x50] sm:$0xff] %vm38_vm1, %v476_v48  ;;  %v457_v54 = vpop.xlane.xlu1 %456  ;;  %v780_v16 = vadd.f32 -112.0, %v590_v9  ;;  %v504_v48 = vld [vmem:[#allocation3 + $0x28] sm:$0xff] }
 0x1c5   :  { %v477_v55 = vadd.f32 %v457_v54, %v413_v49  ;;  %v518_v56 = vpop.xlane.xlu0 %517  ;;  %v625_v61 = vadd.f32 1e-08, %v783_v51 }
 0x1c6   :  { %v548_v59 = vadd.f32 %v518_v56, %v500_v52  ;;  %v591_v63 = vld [vmem:[#allocation3 + $0x48] sm:$0xff]  ;;  %v622_v29 = vadd.f32 1e-08, %v780_v16 }
 0x1c7   :  { %v664_v62 = vld [vmem:[#allocation2 + $0x10] sm:$0xff]  ;;  %494 = vst.msk [vmem:[#allocation2 + $0x58] sm:$0xff] %vm38_vm1, %v477_v55  ;;  %v781_v5 = vadd.f32 -112.0, %v591_v63 }
 0x1c8   :  { %564 = vst.msk [vmem:[#allocation3 + $0x8] sm:$0xff] %vm38_vm1, %v548_v59  ;;  %v437_v1 = vpop.xlane.xlu1 %436  ;;  %920 = vlog2.f32 %v664_v62 }
 0x1c9   :  { %v435_v3 = vpop.xlane.xlu0 %434  ;;  %v467_v4 = vadd.f32 %v437_v1, %v403_v60  ;;  %922 = vlog2.f32 %v617_v58  ;;  %v623_v17 = vadd.f32 1e-08, %v781_v5  ;;  %v917_v25 = vpop.eup %916  ;;  %v512_v1 = vld [vmem:[#allocation3 + $0x68] sm:$0xff] }
 0x1ca   :  { %v665_v6 = vld [vmem:[#allocation2 + $0x18] sm:$0xff]  ;;  %v466_v7 = vadd.f32 %v435_v3, %v402_v0  ;;  %924 = vlog2.f32 %v625_v61  ;;  %v919_v28 = vpop.eup %918  ;;  %v635_v38 = vmul.f32 0.6931472, %v917_v25  ;;  %v511_v3 = vld [vmem:[#allocation3 + $0x60] sm:$0xff] }
 0x1cb   :  { %v672_v10 = vld [vmem:[#allocation2 + $0x50] sm:$0xff]  ;;  %484 = vst.msk [vmem:[#allocation2 + $0x8] sm:$0xff] %vm38_vm1, %v467_v4  ;;  %v651_v50 = vmul.f32 0.6931472, %v919_v28 }
 0x1cc   :  { %926 = vlog2.f32 %v672_v10  ;;  %483 = vst.msk [vmem:[#allocation2] sm:$0xff] %vm38_vm1, %v466_v7  ;;  %v453_v12 = vpop.xlane.xlu1 %452 }
 0x1cd   :  { %928 = vlog2.f32 %v665_v6  ;;  %v451_v14 = vpop.xlane.xlu0 %450  ;;  %v475_v15 = vadd.f32 %v453_v12, %v411_v8 }
 0x1ce   :  { %v673_v18 = vld [vmem:[#allocation2 + $0x58] sm:$0xff]  ;;  %v474_v19 = vadd.f32 %v451_v14, %v410_v11 }
 0x1cf   :  { %930 = vlog2.f32 %v673_v18  ;;  %v583_v21 = vld [vmem:[#allocation3 + $0x8] sm:$0xff]  ;;  %492 = vst.msk [vmem:[#allocation2 + $0x48] sm:$0xff] %vm38_vm1, %v475_v15  ;;  %v409_v14 = vld [vmem:[#allocation2 + $0x38] sm:$0xff]  ;;  %v408_v18 = vld [vmem:[#allocation2 + $0x30] sm:$0xff] }
 0x1d0   :  { %v773_v23 = vadd.f32 -112.0, %v583_v21  ;;  %491 = vst.msk [vmem:[#allocation2 + $0x40] sm:$0xff] %vm38_vm1, %v474_v19  ;;  %v530_v24 = vpop.xlane.xlu1 %529  ;;  %932 = vlog2.f32 %v614_v13 }
 0x1d1   :  { %v528_v26 = vpop.xlane.xlu0 %527  ;;  %v554_v27 = vadd.f32 %v530_v24, %v506_v20  ;;  %934 = vlog2.f32 %v623_v17 }
 0x1d2   :  { %v615_v30 = vadd.f32 1e-08, %v773_v23  ;;  %v663_v31 = vld [vmem:[#allocation2 + $0x8] sm:$0xff]  ;;  %v553_v32 = vadd.f32 %v528_v26, %v505_v22  ;;  %v921_v34 = vpop.eup %920 }
 0x1d3   :  { %v662_v35 = vld [vmem:[#allocation2] sm:$0xff]  ;;  %936 = vlog2.f32 %v663_v31  ;;  %570 = vst.msk [vmem:[#allocation3 + $0x38] sm:$0xff] %vm38_vm1, %v554_v27  ;;  %v923_v37 = vpop.eup %922  ;;  %v683_v39 = vmul.f32 0.6931472, %v921_v34 }
 0x1d4   :  { %938 = vlog2.f32 %v615_v30  ;;  %569 = vst.msk [vmem:[#allocation3 + $0x30] sm:$0xff] %vm38_vm1, %v553_v32  ;;  %v546_v40 = vpop.xlane.xlu1 %545  ;;  %v925_v41 = vpop.eup %924  ;;  %v637_v54 = vmul.f32 0.6931472, %v923_v37 }
 0x1d5   :  { %940 = vlog2.f32 %v662_v35  ;;  %v544_v42 = vpop.xlane.xlu0 %543  ;;  %v562_v43 = vadd.f32 %v546_v40, %v514_v33  ;;  %v712_v45 = vsub.f32 %v635_v38, %v683_v39  ;;  %v653_v61 = vmul.f32 0.6931472, %v925_v41  ;;  %v406_v35 = vld [vmem:[#allocation2 + $0x20] sm:$0xff] }
 0x1d6   :  { %v927_v44 = vpop.eup %926  ;;  %942 = vlog2.f32 %v622_v29  ;;  %v671_v46 = vld [vmem:[#allocation2 + $0x48] sm:$0xff]  ;;  %v561_v47 = vadd.f32 %v544_v42, %v513_v36 }
 0x1d7   :  { %v929_v49 = vpop.eup %928  ;;  %v699_v51 = vmul.f32 0.6931472, %v927_v44  ;;  %v670_v52 = vld [vmem:[#allocation2 + $0x40] sm:$0xff]  ;;  %944 = vlog2.f32 %v671_v46  ;;  %578 = vst.msk [vmem:[#allocation3 + $0x78] sm:$0xff] %vm38_vm1, %v562_v43  ;;  %728 = vst.msk [vmem:[%s1303_s4 + $0x10] sm:$0xff] %vm38_vm1, %v712_v45  ;;  %v407_v36 = vld [vmem:[#allocation2 + $0x28] sm:$0xff] }
 0x1d8   :  { %v685_v55 = vmul.f32 0.6931472, %v929_v49  ;;  %946 = vlog2.f32 %v670_v52  ;;  %577 = vst.msk [vmem:[#allocation3 + $0x70] sm:$0xff] %vm38_vm1, %v561_v47  ;;  %v526_v56 = vpop.xlane.xlu1 %525 }
 0x1d9   :  { %v931_v57 = vpop.eup %930  ;;  %v720_v58 = vsub.f32 %v651_v50, %v699_v51  ;;  %v524_v59 = vpop.xlane.xlu0 %523  ;;  %v552_v60 = vadd.f32 %v526_v56, %v504_v48  ;;  %v415_v51 = vld [vmem:[#allocation2 + $0x68] sm:$0xff] }
 0x1da   :  { %v713_v62 = vsub.f32 %v637_v54, %v685_v55  ;;  %v701_v63 = vmul.f32 0.6931472, %v931_v57  ;;  %v551_v0 = vadd.f32 %v524_v59, %v503_v53  ;;  %v933_v2 = vpop.eup %932  ;;  %v589_v12 = vld [vmem:[#allocation3 + $0x38] sm:$0xff]  ;;  %v414_v54 = vld [vmem:[#allocation2 + $0x60] sm:$0xff] }
 0x1db   :  { %736 = vst.msk [vmem:[%s1303_s4 + $0x50] sm:$0xff] %vm38_vm1, %v720_v58  ;;  %568 = vst.msk [vmem:[#allocation3 + $0x28] sm:$0xff] %vm38_vm1, %v552_v60  ;;  %v935_v4 = vpop.eup %934  ;;  %v588_v17 = vld [vmem:[#allocation3 + $0x30] sm:$0xff]  ;;  %v631_v20 = vmul.f32 0.6931472, %v933_v2  ;;  %v779_v26 = vadd.f32 -112.0, %v589_v12 }
 0x1dc   :  { %729 = vst.msk [vmem:[%s1303_s4 + $0x18] sm:$0xff] %vm38_vm1, %v713_v62  ;;  %v721_v5 = vsub.f32 %v653_v61, %v701_v63  ;;  %567 = vst.msk [vmem:[#allocation3 + $0x20] sm:$0xff] %vm38_vm1, %v551_v0  ;;  %v542_v6 = vpop.xlane.xlu1 %541  ;;  %v649_v24 = vmul.f32 0.6931472, %v935_v4  ;;  %v778_v32 = vadd.f32 -112.0, %v588_v17  ;;  %v416_v63 = vld [vmem:[#allocation2 + $0x70] sm:$0xff] }
 0x1dd   :  { %v937_v7 = vpop.eup %936  ;;  %v540_v8 = vpop.xlane.xlu0 %539  ;;  %v560_v9 = vadd.f32 %v542_v6, %v512_v1  ;;  %v621_v45 = vadd.f32 1e-08, %v779_v26  ;;  %v417_v0 = vld [vmem:[#allocation2 + $0x78] sm:$0xff] }
 0x1de   :  { %v939_v10 = vpop.eup %938  ;;  %737 = vst.msk [vmem:[%s1303_s4 + $0x58] sm:$0xff] %vm38_vm1, %v721_v5  ;;  %v681_v11 = vmul.f32 0.6931472, %v937_v7  ;;  %v559_v13 = vadd.f32 %v540_v8, %v511_v3  ;;  %v620_v48 = vadd.f32 1e-08, %v778_v32  ;;  %v597_v60 = vld [vmem:[#allocation3 + $0x78] sm:$0xff] }
 0x1df   :  { %v941_v15 = vpop.eup %940  ;;  %v633_v16 = vmul.f32 0.6931472, %v939_v10  ;;  %576 = vst.msk [vmem:[#allocation3 + $0x68] sm:$0xff] %vm38_vm1, %v560_v9  ;;  %948 = vlog2.f32 %v621_v45  ;;  %v596_v1 = vld [vmem:[#allocation3 + $0x70] sm:$0xff]  ;;  %v787_v5 = vadd.f32 -112.0, %v597_v60 }
 0x1e0   :  { %v943_v19 = vpop.eup %942  ;;  %v679_v21 = vmul.f32 0.6931472, %v941_v15  ;;  %575 = vst.msk [vmem:[#allocation3 + $0x60] sm:$0xff] %vm38_vm1, %v559_v13  ;;  %v449_v22 = vpop.xlane.xlu1 %448  ;;  %950 = vlog2.f32 %v620_v48  ;;  %v786_v9 = vadd.f32 -112.0, %v596_v1 }
 0x1e1   :  { %v945_v23 = vpop.eup %944  ;;  %v711_v25 = vsub.f32 %v633_v16, %v681_v11  ;;  %v447_v27 = vpop.xlane.xlu0 %446  ;;  %v473_v28 = vadd.f32 %v449_v22, %v409_v14  ;;  %v647_v37 = vmul.f32 0.6931472, %v943_v19  ;;  %v629_v14 = vadd.f32 1e-08, %v787_v5 }
 0x1e2   :  { %v947_v29 = vpop.eup %946  ;;  %v710_v30 = vsub.f32 %v631_v20, %v679_v21  ;;  %v697_v31 = vmul.f32 0.6931472, %v945_v23  ;;  %v587_v33 = vld [vmem:[#allocation3 + $0x28] sm:$0xff]  ;;  %v472_v34 = vadd.f32 %v447_v27, %v408_v18  ;;  %v628_v15 = vadd.f32 1e-08, %v786_v9 }
 0x1e3   :  { %727 = vst.msk [vmem:[%s1303_s4 + $0x8] sm:$0xff] %vm38_vm1, %v711_v25  ;;  %v695_v38 = vmul.f32 0.6931472, %v947_v29  ;;  %v586_v39 = vld [vmem:[#allocation3 + $0x20] sm:$0xff]  ;;  %v777_v40 = vadd.f32 -112.0, %v587_v33  ;;  %490 = vst.msk [vmem:[#allocation2 + $0x38] sm:$0xff] %vm38_vm1, %v473_v28 }
 0x1e4   :  { %726 = vst.msk [vmem:[%s1303_s4] sm:$0xff] %vm38_vm1, %v710_v30  ;;  %v719_v41 = vsub.f32 %v649_v24, %v697_v31  ;;  %v776_v42 = vadd.f32 -112.0, %v586_v39  ;;  %489 = vst.msk [vmem:[#allocation2 + $0x30] sm:$0xff] %vm38_vm1, %v472_v34  ;;  %v445_v43 = vpop.xlane.xlu1 %444 }
 0x1e5   :  { %v718_v44 = vsub.f32 %v647_v37, %v695_v38  ;;  %v443_v46 = vpop.xlane.xlu0 %442  ;;  %v471_v47 = vadd.f32 %v445_v43, %v407_v36  ;;  %v619_v52 = vadd.f32 1e-08, %v777_v40 }
 0x1e6   :  { %735 = vst.msk [vmem:[%s1303_s4 + $0x48] sm:$0xff] %vm38_vm1, %v719_v41  ;;  %v595_v49 = vld [vmem:[#allocation3 + $0x68] sm:$0xff]  ;;  %v470_v50 = vadd.f32 %v443_v46, %v406_v35  ;;  %v618_v55 = vadd.f32 1e-08, %v776_v42 }
 0x1e7   :  { %734 = vst.msk [vmem:[%s1303_s4 + $0x40] sm:$0xff] %vm38_vm1, %v718_v44  ;;  %v594_v53 = vld [vmem:[#allocation3 + $0x60] sm:$0xff]  ;;  %488 = vst.msk [vmem:[#allocation2 + $0x28] sm:$0xff] %vm38_vm1, %v471_v47  ;;  %v785_v57 = vadd.f32 -112.0, %v595_v49  ;;  %952 = vlog2.f32 %v619_v52 }
 0x1e8   :  { %487 = vst.msk [vmem:[#allocation2 + $0x20] sm:$0xff] %vm38_vm1, %v470_v50  ;;  %v461_v56 = vpop.xlane.xlu1 %460  ;;  %v784_v61 = vadd.f32 -112.0, %v594_v53  ;;  %954 = vlog2.f32 %v618_v55 }
 0x1e9   :  { %v459_v58 = vpop.xlane.xlu0 %458  ;;  %v479_v59 = vadd.f32 %v461_v56, %v415_v51  ;;  %v627_v6 = vadd.f32 1e-08, %v785_v57  ;;  %v949_v17 = vpop.eup %948 }
 0x1ea   :  { %v478_v62 = vadd.f32 %v459_v58, %v414_v54  ;;  %v669_v3 = vld [vmem:[#allocation2 + $0x38] sm:$0xff]  ;;  %v626_v10 = vadd.f32 1e-08, %v784_v61  ;;  %v951_v19 = vpop.eup %950  ;;  %v645_v29 = vmul.f32 0.6931472, %v949_v17 }
 0x1eb   :  { %v668_v2 = vld [vmem:[#allocation2 + $0x30] sm:$0xff]  ;;  %496 = vst.msk [vmem:[#allocation2 + $0x68] sm:$0xff] %vm38_vm1, %v479_v59  ;;  %v643_v26 = vmul.f32 0.6931472, %v951_v19 }
 0x1ec   :  { %495 = vst.msk [vmem:[#allocation2 + $0x60] sm:$0xff] %vm38_vm1, %v478_v62  ;;  %v465_v4 = vpop.xlane.xlu1 %464  ;;  %956 = vlog2.f32 %v668_v2 }
 0x1ed   :  { %v463_v7 = vpop.xlane.xlu0 %462  ;;  %v481_v8 = vadd.f32 %v465_v4, %v417_v0  ;;  %958 = vlog2.f32 %v669_v3 }
 0x1ee   :  { %v667_v11 = vld [vmem:[#allocation2 + $0x28] sm:$0xff]  ;;  %v480_v12 = vadd.f32 %v463_v7, %v416_v63 }
 0x1ef   :  { %v666_v13 = vld [vmem:[#allocation2 + $0x20] sm:$0xff]  ;;  %960 = vlog2.f32 %v667_v11  ;;  %498 = vst.msk [vmem:[#allocation2 + $0x78] sm:$0xff] %vm38_vm1, %v481_v8 }
 0x1f0   :  { %962 = vlog2.f32 %v666_v13  ;;  %497 = vst.msk [vmem:[#allocation2 + $0x70] sm:$0xff] %vm38_vm1, %v480_v12 }
 0x1f1   :  { %964 = vlog2.f32 %v627_v6  ;;  %v953_v20 = vpop.eup %952 }
 0x1f2   :  { %966 = vlog2.f32 %v626_v10  ;;  %v675_v16 = vld [vmem:[#allocation2 + $0x68] sm:$0xff]  ;;  %v955_v21 = vpop.eup %954  ;;  %v641_v32 = vmul.f32 0.6931472, %v953_v20 }
 0x1f3   :  { %v674_v18 = vld [vmem:[#allocation2 + $0x60] sm:$0xff]  ;;  %968 = vlog2.f32 %v675_v16  ;;  %v639_v36 = vmul.f32 0.6931472, %v955_v21 }
 0x1f4   :  { %970 = vlog2.f32 %v674_v18 }
 0x1f5   :  { %972 = vlog2.f32 %v629_v14 }
 0x1f6   :  { %974 = vlog2.f32 %v628_v15  ;;  %v677_v22 = vld [vmem:[#allocation2 + $0x78] sm:$0xff]  ;;  %v957_v23 = vpop.eup %956 }
 0x1f7   :  { %v676_v24 = vld [vmem:[#allocation2 + $0x70] sm:$0xff]  ;;  %976 = vlog2.f32 %v677_v22  ;;  %v959_v25 = vpop.eup %958  ;;  %v691_v27 = vmul.f32 0.6931472, %v957_v23 }
 0x1f8   :  { %978 = vlog2.f32 %v676_v24  ;;  %v693_v30 = vmul.f32 0.6931472, %v959_v25 }
 0x1f9   :  { %v961_v28 = vpop.eup %960  ;;  %v716_v33 = vsub.f32 %v643_v26, %v691_v27 }
 0x1fa   :  { %v963_v31 = vpop.eup %962  ;;  %v689_v34 = vmul.f32 0.6931472, %v961_v28  ;;  %v717_v37 = vsub.f32 %v645_v29, %v693_v30 }
 0x1fb   :  { %v965_v35 = vpop.eup %964  ;;  %v687_v38 = vmul.f32 0.6931472, %v963_v31  ;;  %732 = vst.msk [vmem:[%s1303_s4 + $0x30] sm:$0xff] %vm38_vm1, %v716_v33 }
 0x1fc   :  { %v967_v39 = vpop.eup %966  ;;  %v715_v40 = vsub.f32 %v641_v32, %v689_v34  ;;  %733 = vst.msk [vmem:[%s1303_s4 + $0x38] sm:$0xff] %vm38_vm1, %v717_v37  ;;  %v657_v44 = vmul.f32 0.6931472, %v965_v35 }
 0x1fd   :  { %v969_v41 = vpop.eup %968  ;;  %v714_v42 = vsub.f32 %v639_v36, %v687_v38  ;;  %v655_v47 = vmul.f32 0.6931472, %v967_v39 }
 0x1fe   :  { %v971_v43 = vpop.eup %970  ;;  %731 = vst.msk [vmem:[%s1303_s4 + $0x28] sm:$0xff] %vm38_vm1, %v715_v40  ;;  %v705_v45 = vmul.f32 0.6931472, %v969_v41 }
 0x1ff   :  { %v973_v46 = vpop.eup %972  ;;  %730 = vst.msk [vmem:[%s1303_s4 + $0x20] sm:$0xff] %vm38_vm1, %v714_v42  ;;  %v703_v48 = vmul.f32 0.6931472, %v971_v43 }
 0x200   :  { %v975_v49 = vpop.eup %974  ;;  %v723_v50 = vsub.f32 %v657_v44, %v705_v45  ;;  %v661_v54 = vmul.f32 0.6931472, %v973_v46 }
 0x201   :  { %v977_v51 = vpop.eup %976  ;;  %v722_v52 = vsub.f32 %v655_v47, %v703_v48  ;;  %v659_v56 = vmul.f32 0.6931472, %v975_v49 }
 0x202   :  { %v979_v53 = vpop.eup %978  ;;  %739 = vst.msk [vmem:[%s1303_s4 + $0x68] sm:$0xff] %vm38_vm1, %v723_v50  ;;  %v709_v55 = vmul.f32 0.6931472, %v977_v51 }
 0x203   :  { %738 = vst.msk [vmem:[%s1303_s4 + $0x60] sm:$0xff] %vm38_vm1, %v722_v52  ;;  %v707_v57 = vmul.f32 0.6931472, %v979_v53 }
 0x204   :  { %v725_v58 = vsub.f32 %v661_v54, %v709_v55 }
 0x205   :  { %v724_v59 = vsub.f32 %v659_v56, %v707_v57 }
 0x206   :  { %741 = vst.msk [vmem:[%s1303_s4 + $0x78] sm:$0xff] %vm38_vm1, %v725_v58 }
 0x207   :  { %740 = vst.msk [vmem:[%s1303_s4 + $0x70] sm:$0xff] %vm38_vm1, %v724_v59 }

</bundles_post_ra>
